<compile_context>
chip_gen: v6e
topology: v6e:2x2x1
jax: 0.10.0
libtpu: 0.0.40
codegen_flags: <defaults>
</compile_context>

<pallas_src>
import math
import itertools
from functools import partial

import jax
import jax.numpy as jnp
from jax import lax
from jax.experimental import pallas as pl
from jax.experimental.pallas import tpu as pltpu


# contract the last axis of both operands (i.e. A @ B^T with B in (out, in) layout)
_DN_LAST = (((1,), (1,)), ((), ()))


def _lap_kernel(x_ref, wq_ref, wv_ref, lap_ref, v_ref, *, scale, num_heads):
    """Per-batch tile: all-head q/v projection + per-head normalized Laplacian.

    x_ref : (1, N, C) bf16     wq_ref, wv_ref : (C, C) bf16
    lap_ref : (1, H, N, N) f32     v_ref : (1, N, C) bf16
    """
    x = x_ref[0]                                                    # (N, C) bf16

    # Full-depth head-fused projections (K=C), f32 accumulation on the MXU.
    q = lax.dot_general(x, wq_ref[...], _DN_LAST,
                        preferred_element_type=jnp.float32)          # (N, C)
    v = lax.dot_general(x, wv_ref[...], _DN_LAST,
                        preferred_element_type=jnp.float32)          # (N, C)
    v_ref[0, :, :] = v.astype(v_ref.dtype)                           # lane-dense store

    N, C = x.shape
    c = C // num_heads
    row = lax.broadcasted_iota(jnp.int32, (N, N), 0)
    col = lax.broadcasted_iota(jnp.int32, (N, N), 1)
    eye = row == col

    for h in range(num_heads):                                       # static unroll
        qh = q[:, h * c:(h + 1) * c]                                 # (N, c) f32
        # kept in f32 for the logits that feed eigh (inputs were already bf16)
        attn = scale * lax.dot_general(qh, qh, _DN_LAST,
                                       preferred_element_type=jnp.float32)  # (N, N)

        # mask diagonal with -inf, softmax over last dim (EUP exp + approx recip)
        attn = jnp.where(eye, -jnp.inf, attn)
        attn = attn - jnp.max(attn, axis=-1, keepdims=True)
        e = jnp.exp(attn)
        attn = e * pl.reciprocal(jnp.sum(e, axis=-1, keepdims=True), approx=True)

        # symmetrize
        attn = 0.5 * (attn + attn.T)

        # normalized Laplacian: D^-1/2 (D - A) D^-1/2
        deg_vec = jnp.sum(attn, axis=-1, keepdims=True)              # (N, 1)
        deg = jnp.where(eye, deg_vec, 0.0)                           # diag_embed
        inv_sqrt = lax.rsqrt(deg_vec)                                # (N, 1), EUP
        lap = inv_sqrt * (deg - attn) * inv_sqrt.T                   # (N, N)

        lap_ref[0, h, :, :] = lap


def _group_proj_kernel(combs_ref, evec_ref, v_ref, wp_ref, bp_ref, out_ref,
                       *, num_heads):
    """Per-batch tile: +/-1 sign-combination attention over eigenvectors + proj.

    combs_ref : (N_out, N_eigs) f32   evec_ref : (1, H, N_eigs, N) f32
    v_ref : (1, N, C) bf16            wp_ref : (C, c) bf16   bp_ref : (1, C) f32
    out_ref : (1, H*N_out, C) f32     (lane-dense, head-major rows)
    """
    combs = combs_ref[...]                                           # (N_out, N_eigs)
    v = v_ref[0]                                                     # (N, C) bf16
    wp = wp_ref[...]                                                 # (C, c) bf16
    bp = bp_ref[...]                                                 # (1, C) f32

    n_out, n_eigs = combs.shape
    N, C = v.shape
    c = C // num_heads

    for h in range(num_heads):                                       # static unroll
        evh = evec_ref[0, h]                                         # (N_eigs, N) f32

        # +/-1 combinations as signed adds of eigenvector rows (VPU, no MXU pass)
        ga = jnp.zeros((n_out, N), jnp.float32)
        for e in range(n_eigs):
            ga = ga + combs[:, e:e + 1] * evh[e:e + 1, :]

        ga = ga - jnp.max(ga, axis=-1, keepdims=True)
        p = jnp.exp(ga)
        ga = p * pl.reciprocal(jnp.sum(p, axis=-1, keepdims=True), approx=True)

        vh = v[:, h * c:(h + 1) * c]                                 # (N, c) bf16
        xh = jnp.dot(ga.astype(vh.dtype), vh,
                     preferred_element_type=jnp.float32)             # (N_out, c)
        outh = lax.dot_general(xh.astype(wp.dtype), wp, _DN_LAST,
                               preferred_element_type=jnp.float32) + bp  # (N_out, C)

        out_ref[0, h * n_out:(h + 1) * n_out, :] = outh


def attention_subblock(x, eta, params, num_heads):
    B, N, C = x.shape
    H = num_heads
    assert C % H == 0
    c = C // H
    scale = c ** (-0.5)
    N_eigs = max(int(math.log2(N * eta / H)), 1)
    N_out = 2 ** N_eigs

    # Split qkv weight into the q- and v-halves (k is unused by the forward);
    # rows are already head-major ((H, c) grouping), so q[:, h*c:(h+1)*c] is head h.
    wqkv = params["w_qkv"]                                 # (3C, C) PyTorch layout
    wq_all = wqkv[:C].astype(jnp.bfloat16)                 # (C, C)
    wv_all = wqkv[2 * C:3 * C].astype(jnp.bfloat16)        # (C, C)
    x_bf = x.astype(jnp.bfloat16)

    lap, v = pl.pallas_call(
        partial(_lap_kernel, scale=scale, num_heads=H),
        out_shape=(jax.ShapeDtypeStruct((B, H, N, N), jnp.float32),
                   jax.ShapeDtypeStruct((B, N, C), jnp.bfloat16)),
        grid=(B,),
        in_specs=[pl.BlockSpec((1, N, C), lambda b: (b, 0, 0)),
                  pl.BlockSpec((C, C), lambda b: (0, 0)),     # constant -> one DMA
                  pl.BlockSpec((C, C), lambda b: (0, 0))],
        out_specs=(pl.BlockSpec((1, H, N, N), lambda b: (b, 0, 0, 0)),
                   pl.BlockSpec((1, N, C), lambda b: (b, 0, 0))),
        compiler_params=pltpu.CompilerParams(
            dimension_semantics=("parallel",)),
    )(x_bf, wq_all, wv_all)

    # Batched eigendecomposition (Batched_ED_Plus) has no Pallas equivalent:
    # done with jnp.linalg.eigh in plain JAX. eigh returns ascending eigenvalues
    # with eigenvectors as columns -> transpose to row-eigenvectors, drop the
    # trivial (smallest) one, keep the next N_eigs (matches eig_vecs[:, 1:N_eigs+1]).
    # TODO(synk): eigenvector signs are ambiguous; sign flips only permute the
    # 2^N_eigs sign-combination axis, so the output set is equivalent.
    _evals, evecs = jnp.linalg.eigh(lap.reshape(B * H, N, N))
    evec_rows = jnp.swapaxes(evecs, -1, -2)[:, 1:N_eigs + 1]         # (B*H, N_eigs, N)
    evec_rows = evec_rows.reshape(B, H, N_eigs, N).astype(jnp.float32)

    # torch.cartesian_prod([1,-1], ... N_eigs times) -> (N_out, N_eigs), +/-1 signs
    combs = jnp.asarray(list(itertools.product((1.0, -1.0), repeat=N_eigs)),
                        dtype=jnp.float32)

    wp = params["w_proj"].astype(jnp.bfloat16)             # (C, c)
    bp = params["b_proj"].reshape(1, C).astype(jnp.float32)

    out = pl.pallas_call(
        partial(_group_proj_kernel, num_heads=H),
        out_shape=jax.ShapeDtypeStruct((B, H * N_out, C), jnp.float32),
        grid=(B,),
        in_specs=[pl.BlockSpec((N_out, N_eigs), lambda b: (0, 0)),
                  pl.BlockSpec((1, H, N_eigs, N), lambda b: (b, 0, 0, 0)),
                  pl.BlockSpec((1, N, C), lambda b: (b, 0, 0)),
                  pl.BlockSpec((C, c), lambda b: (0, 0)),
                  pl.BlockSpec((1, C), lambda b: (0, 0))],
        out_specs=pl.BlockSpec((1, H * N_out, C), lambda b: (b, 0, 0)),
        compiler_params=pltpu.CompilerParams(
            dimension_semantics=("parallel",)),
    )(combs, evec_rows, v, wp, bp)

    # already (B, H*N_out, C), head-major rows — same as torch reshape + proj
    return out


if __name__ == "__main__":
    B, N, C, H = 2, 16, 32, 4          # dim=32, num_heads=4 -> head_dim=8
    eta = 1.0                           # N_eigs = log2(16*1/4) = 2, N_out = 4
    c = C // H

    key = jax.random.PRNGKey(0)
    k1, k2, k3, k4 = jax.random.split(key, 4)
    x = jax.random.normal(k1, (B, N, C), dtype=jnp.float32)
    params = {
        "w_qkv": jax.random.normal(k2, (3 * C, C), jnp.float32) / math.sqrt(C),
        "w_proj": jax.random.normal(k3, (C, c), jnp.float32) / math.sqrt(c),
        "b_proj": 0.01 * jax.random.normal(k4, (C,), jnp.float32),
    }

    out = attention_subblock(x, eta, params, num_heads=H)
    out = jax.block_until_ready(out)

    N_eigs = max(int(math.log2(N * eta / H)), 1)
    expected_shape = (B, H * (2 ** N_eigs), C)
    assert out.shape == expected_shape, (out.shape, expected_shape)
    assert bool(jnp.all(jnp.isfinite(out)))
    print("KERNEL_OK")
</pallas_src>

<mosaic_0001>
module attributes {stable_mosaic.version = 11 : i64} {
  func.func @_lap_kernel(%arg0: i32, %arg1: memref<1x16x32xbf16, #tpu.memory_space<vmem>>, %arg2: memref<32x32xbf16, #tpu.memory_space<vmem>>, %arg3: memref<32x32xbf16, #tpu.memory_space<vmem>>, %arg4: memref<1x4x16x16xf32, #tpu.memory_space<vmem>>, %arg5: memref<1x16x32xbf16, #tpu.memory_space<vmem>>) attributes {dimension_semantics = [#tpu.dimension_semantics<parallel>], iteration_bounds = array<i64: 2>, scalar_prefetch = 0 : i64, scratch_operands = 0 : i64, tpu.core_type = #tpu.core_type<tc>, window_params = [{transform_indices = @transform_0, window_bounds = array<i64: 1, 16, 32>}, {pipeline_mode = #tpu.pipeline_mode<synchronous>, transform_indices = @transform_1, window_bounds = array<i64: 32, 32>}, {pipeline_mode = #tpu.pipeline_mode<synchronous>, transform_indices = @transform_2, window_bounds = array<i64: 32, 32>}, {transform_indices = @transform_3, window_bounds = array<i64: 1, 4, 16, 16>}, {transform_indices = @transform_4, window_bounds = array<i64: 1, 16, 32>}]} {
    %c0 = arith.constant 0 : index
    %c0_0 = arith.constant 0 : index
    %c0_1 = arith.constant 0 : index
    %0 = vector.load %arg1[%c0, %c0_0, %c0_1] : memref<1x16x32xbf16, #tpu.memory_space<vmem>>, vector<1x16x32xbf16>
    %1 = vector.shape_cast %0 : vector<1x16x32xbf16> to vector<16x32xbf16>
    %c0_2 = arith.constant 0 : index
    %c0_3 = arith.constant 0 : index
    %2 = vector.load %arg2[%c0_2, %c0_3] : memref<32x32xbf16, #tpu.memory_space<vmem>>, vector<32x32xbf16>
    %cst = arith.constant dense<0.000000e+00> : vector<16x32xf32>
    %3 = tpu.matmul %1, %2, %cst {dimension_numbers = #tpu.dot_dimension_numbers<[1], [1], [0], [0], [0, 0, 1, 0], [], []>} : vector<16x32xbf16>, vector<32x32xbf16>, vector<16x32xf32> -> vector<16x32xf32>
    %c0_4 = arith.constant 0 : index
    %c0_5 = arith.constant 0 : index
    %4 = vector.load %arg3[%c0_4, %c0_5] : memref<32x32xbf16, #tpu.memory_space<vmem>>, vector<32x32xbf16>
    %cst_6 = arith.constant dense<0.000000e+00> : vector<16x32xf32>
    %5 = tpu.matmul %1, %4, %cst_6 {dimension_numbers = #tpu.dot_dimension_numbers<[1], [1], [0], [0], [0, 0, 1, 0], [], []>} : vector<16x32xbf16>, vector<32x32xbf16>, vector<16x32xf32> -> vector<16x32xf32>
    %6 = arith.truncf %5 : vector<16x32xf32> to vector<16x32xbf16>
    %c0_7 = arith.constant 0 : index
    %c0_8 = arith.constant 0 : index
    %c0_9 = arith.constant 0 : index
    %7 = vector.load %arg5[%c0_7, %c0_8, %c0_9] : memref<1x16x32xbf16, #tpu.memory_space<vmem>>, vector<1x16x32xbf16>
    %8 = vector.shape_cast %7 : vector<1x16x32xbf16> to vector<16x32xbf16>
    %9 = vector.shape_cast %6 : vector<16x32xbf16> to vector<1x16x32xbf16>
    tpu.vector_store %arg5[%c0_7, %c0_8, %c0_9], %9 {strides = array<i32>} : memref<1x16x32xbf16, #tpu.memory_space<vmem>>, vector<1x16x32xbf16>,
    %10 = tpu.iota {dimensions = array<i32: 0>} : vector<16x16xi32>
    %11 = tpu.iota {dimensions = array<i32: 1>} : vector<16x16xi32>
    %12 = arith.cmpi eq, %10, %11 : vector<16x16xi32>
    %13 = vector.extract_strided_slice %3 {offsets = [0, 0], sizes = [16, 8], strides = [1, 1]} : vector<16x32xf32> to vector<16x8xf32>
    %cst_10 = arith.constant dense<0.000000e+00> : vector<16x16xf32>
    %14 = tpu.matmul %13, %13, %cst_10 {dimension_numbers = #tpu.dot_dimension_numbers<[1], [1], [0], [0], [0, 0, 1, 0], [], []>} : vector<16x8xf32>, vector<16x8xf32>, vector<16x16xf32> -> vector<16x16xf32>
    %cst_11 = arith.constant 0.353553385 : f32
    %15 = vector.broadcast %cst_11 : f32 to vector<16x16xf32>
    %16 = arith.mulf %15, %14 : vector<16x16xf32>
    %cst_12 = arith.constant 0xFF800000 : f32
    %17 = vector.broadcast %cst_12 : f32 to vector<16x16xf32>
    %18 = arith.select %12, %17, %16 : vector<16x16xi1>, vector<16x16xf32>
    %cst_13 = arith.constant dense<0xFF800000> : vector<16xf32>
    %19 = vector.multi_reduction <maximumf>, %18, %cst_13 [1] : vector<16x16xf32> to vector<16xf32>
    %20 = vector.shape_cast %19 : vector<16xf32> to vector<16x1xf32>
    %21 = vector.broadcast %20 : vector<16x1xf32> to vector<16x16xf32>
    %22 = arith.subf %18, %21 : vector<16x16xf32>
    %23 = math.exp %22 : vector<16x16xf32>
    %cst_14 = arith.constant dense<0.000000e+00> : vector<16xf32>
    %24 = vector.multi_reduction <add>, %23, %cst_14 [1] : vector<16x16xf32> to vector<16xf32>
    %25 = vector.shape_cast %24 : vector<16xf32> to vector<16x1xf32>
    %26 = tpu.reciprocal %25 {approx = true} : vector<16x1xf32> -> vector<16x1xf32>
    %27 = vector.broadcast %26 : vector<16x1xf32> to vector<16x16xf32>
    %28 = arith.mulf %23, %27 : vector<16x16xf32>
    %29 = tpu.transpose %28, [1, 0] : vector<16x16xf32> -> vector<16x16xf32>
    %30 = arith.addf %28, %29 : vector<16x16xf32>
    %cst_15 = arith.constant 5.000000e-01 : f32
    %31 = vector.broadcast %cst_15 : f32 to vector<16x16xf32>
    %32 = arith.mulf %31, %30 : vector<16x16xf32>
    %cst_16 = arith.constant dense<0.000000e+00> : vector<16xf32>
    %33 = vector.multi_reduction <add>, %32, %cst_16 [1] : vector<16x16xf32> to vector<16xf32>
    %34 = vector.shape_cast %33 : vector<16xf32> to vector<16x1xf32>
    %cst_17 = arith.constant 0.000000e+00 : f32
    %35 = vector.shape_cast %34 : vector<16x1xf32> to vector<16x1xf32>
    %36 = vector.broadcast %35 : vector<16x1xf32> to vector<16x16xf32>
    %37 = vector.broadcast %cst_17 : f32 to vector<16x16xf32>
    %38 = arith.select %12, %36, %37 : vector<16x16xi1>, vector<16x16xf32>
    %39 = math.rsqrt %34 : vector<16x1xf32>
    %40 = arith.subf %38, %32 : vector<16x16xf32>
    %41 = vector.broadcast %39 : vector<16x1xf32> to vector<16x16xf32>
    %42 = arith.mulf %41, %40 : vector<16x16xf32>
    %43 = tpu.transpose %39, [1, 0] : vector<16x1xf32> -> vector<1x16xf32>
    %44 = vector.broadcast %43 : vector<1x16xf32> to vector<16x16xf32>
    %45 = arith.mulf %42, %44 : vector<16x16xf32>
    %c0_18 = arith.constant 0 : index
    %c0_19 = arith.constant 0 : index
    %c0_20 = arith.constant 0 : index
    %c0_21 = arith.constant 0 : index
    %46 = vector.load %arg4[%c0_18, %c0_19, %c0_20, %c0_21] : memref<1x4x16x16xf32, #tpu.memory_space<vmem>>, vector<1x1x16x16xf32>
    %47 = vector.shape_cast %46 : vector<1x1x16x16xf32> to vector<16x16xf32>
    %48 = vector.shape_cast %45 : vector<16x16xf32> to vector<1x1x16x16xf32>
    tpu.vector_store %arg4[%c0_18, %c0_19, %c0_20, %c0_21], %48 {strides = array<i32>} : memref<1x4x16x16xf32, #tpu.memory_space<vmem>>, vector<1x1x16x16xf32>,
    %49 = vector.extract_strided_slice %3 {offsets = [0, 8], sizes = [16, 8], strides = [1, 1]} : vector<16x32xf32> to vector<16x8xf32>
    %cst_22 = arith.constant dense<0.000000e+00> : vector<16x16xf32>
    %50 = tpu.matmul %49, %49, %cst_22 {dimension_numbers = #tpu.dot_dimension_numbers<[1], [1], [0], [0], [0, 0, 1, 0], [], []>} : vector<16x8xf32>, vector<16x8xf32>, vector<16x16xf32> -> vector<16x16xf32>
    %cst_23 = arith.constant 0.353553385 : f32
    %51 = vector.broadcast %cst_23 : f32 to vector<16x16xf32>
    %52 = arith.mulf %51, %50 : vector<16x16xf32>
    %cst_24 = arith.constant 0xFF800000 : f32
    %53 = vector.broadcast %cst_24 : f32 to vector<16x16xf32>
    %54 = arith.select %12, %53, %52 : vector<16x16xi1>, vector<16x16xf32>
    %cst_25 = arith.constant dense<0xFF800000> : vector<16xf32>
    %55 = vector.multi_reduction <maximumf>, %54, %cst_25 [1] : vector<16x16xf32> to vector<16xf32>
    %56 = vector.shape_cast %55 : vector<16xf32> to vector<16x1xf32>
    %57 = vector.broadcast %56 : vector<16x1xf32> to vector<16x16xf32>
    %58 = arith.subf %54, %57 : vector<16x16xf32>
    %59 = math.exp %58 : vector<16x16xf32>
    %cst_26 = arith.constant dense<0.000000e+00> : vector<16xf32>
    %60 = vector.multi_reduction <add>, %59, %cst_26 [1] : vector<16x16xf32> to vector<16xf32>
    %61 = vector.shape_cast %60 : vector<16xf32> to vector<16x1xf32>
    %62 = tpu.reciprocal %61 {approx = true} : vector<16x1xf32> -> vector<16x1xf32>
    %63 = vector.broadcast %62 : vector<16x1xf32> to vector<16x16xf32>
    %64 = arith.mulf %59, %63 : vector<16x16xf32>
    %65 = tpu.transpose %64, [1, 0] : vector<16x16xf32> -> vector<16x16xf32>
    %66 = arith.addf %64, %65 : vector<16x16xf32>
    %cst_27 = arith.constant 5.000000e-01 : f32
    %67 = vector.broadcast %cst_27 : f32 to vector<16x16xf32>
    %68 = arith.mulf %67, %66 : vector<16x16xf32>
    %cst_28 = arith.constant dense<0.000000e+00> : vector<16xf32>
    %69 = vector.multi_reduction <add>, %68, %cst_28 [1] : vector<16x16xf32> to vector<16xf32>
    %70 = vector.shape_cast %69 : vector<16xf32> to vector<16x1xf32>
    %cst_29 = arith.constant 0.000000e+00 : f32
    %71 = vector.shape_cast %70 : vector<16x1xf32> to vector<16x1xf32>
    %72 = vector.broadcast %71 : vector<16x1xf32> to vector<16x16xf32>
    %73 = vector.broadcast %cst_29 : f32 to vector<16x16xf32>
    %74 = arith.select %12, %72, %73 : vector<16x16xi1>, vector<16x16xf32>
    %75 = math.rsqrt %70 : vector<16x1xf32>
    %76 = arith.subf %74, %68 : vector<16x16xf32>
    %77 = vector.broadcast %75 : vector<16x1xf32> to vector<16x16xf32>
    %78 = arith.mulf %77, %76 : vector<16x16xf32>
    %79 = tpu.transpose %75, [1, 0] : vector<16x1xf32> -> vector<1x16xf32>
    %80 = vector.broadcast %79 : vector<1x16xf32> to vector<16x16xf32>
    %81 = arith.mulf %78, %80 : vector<16x16xf32>
    %c0_30 = arith.constant 0 : index
    %c1 = arith.constant 1 : index
    %c0_31 = arith.constant 0 : index
    %c0_32 = arith.constant 0 : index
    %82 = vector.load %arg4[%c0_30, %c1, %c0_31, %c0_32] : memref<1x4x16x16xf32, #tpu.memory_space<vmem>>, vector<1x1x16x16xf32>
    %83 = vector.shape_cast %82 : vector<1x1x16x16xf32> to vector<16x16xf32>
    %84 = vector.shape_cast %81 : vector<16x16xf32> to vector<1x1x16x16xf32>
    tpu.vector_store %arg4[%c0_30, %c1, %c0_31, %c0_32], %84 {strides = array<i32>} : memref<1x4x16x16xf32, #tpu.memory_space<vmem>>, vector<1x1x16x16xf32>,
    %85 = vector.extract_strided_slice %3 {offsets = [0, 16], sizes = [16, 8], strides = [1, 1]} : vector<16x32xf32> to vector<16x8xf32>
    %cst_33 = arith.constant dense<0.000000e+00> : vector<16x16xf32>
    %86 = tpu.matmul %85, %85, %cst_33 {dimension_numbers = #tpu.dot_dimension_numbers<[1], [1], [0], [0], [0, 0, 1, 0], [], []>} : vector<16x8xf32>, vector<16x8xf32>, vector<16x16xf32> -> vector<16x16xf32>
    %cst_34 = arith.constant 0.353553385 : f32
    %87 = vector.broadcast %cst_34 : f32 to vector<16x16xf32>
    %88 = arith.mulf %87, %86 : vector<16x16xf32>
    %cst_35 = arith.constant 0xFF800000 : f32
    %89 = vector.broadcast %cst_35 : f32 to vector<16x16xf32>
    %90 = arith.select %12, %89, %88 : vector<16x16xi1>, vector<16x16xf32>
    %cst_36 = arith.constant dense<0xFF800000> : vector<16xf32>
    %91 = vector.multi_reduction <maximumf>, %90, %cst_36 [1] : vector<16x16xf32> to vector<16xf32>
    %92 = vector.shape_cast %91 : vector<16xf32> to vector<16x1xf32>
    %93 = vector.broadcast %92 : vector<16x1xf32> to vector<16x16xf32>
    %94 = arith.subf %90, %93 : vector<16x16xf32>
    %95 = math.exp %94 : vector<16x16xf32>
    %cst_37 = arith.constant dense<0.000000e+00> : vector<16xf32>
    %96 = vector.multi_reduction <add>, %95, %cst_37 [1] : vector<16x16xf32> to vector<16xf32>
    %97 = vector.shape_cast %96 : vector<16xf32> to vector<16x1xf32>
    %98 = tpu.reciprocal %97 {approx = true} : vector<16x1xf32> -> vector<16x1xf32>
    %99 = vector.broadcast %98 : vector<16x1xf32> to vector<16x16xf32>
    %100 = arith.mulf %95, %99 : vector<16x16xf32>
    %101 = tpu.transpose %100, [1, 0] : vector<16x16xf32> -> vector<16x16xf32>
    %102 = arith.addf %100, %101 : vector<16x16xf32>
    %cst_38 = arith.constant 5.000000e-01 : f32
    %103 = vector.broadcast %cst_38 : f32 to vector<16x16xf32>
    %104 = arith.mulf %103, %102 : vector<16x16xf32>
    %cst_39 = arith.constant dense<0.000000e+00> : vector<16xf32>
    %105 = vector.multi_reduction <add>, %104, %cst_39 [1] : vector<16x16xf32> to vector<16xf32>
    %106 = vector.shape_cast %105 : vector<16xf32> to vector<16x1xf32>
    %cst_40 = arith.constant 0.000000e+00 : f32
    %107 = vector.shape_cast %106 : vector<16x1xf32> to vector<16x1xf32>
    %108 = vector.broadcast %107 : vector<16x1xf32> to vector<16x16xf32>
    %109 = vector.broadcast %cst_40 : f32 to vector<16x16xf32>
    %110 = arith.select %12, %108, %109 : vector<16x16xi1>, vector<16x16xf32>
    %111 = math.rsqrt %106 : vector<16x1xf32>
    %112 = arith.subf %110, %104 : vector<16x16xf32>
    %113 = vector.broadcast %111 : vector<16x1xf32> to vector<16x16xf32>
    %114 = arith.mulf %113, %112 : vector<16x16xf32>
    %115 = tpu.transpose %111, [1, 0] : vector<16x1xf32> -> vector<1x16xf32>
    %116 = vector.broadcast %115 : vector<1x16xf32> to vector<16x16xf32>
    %117 = arith.mulf %114, %116 : vector<16x16xf32>
    %c0_41 = arith.constant 0 : index
    %c2 = arith.constant 2 : index
    %c0_42 = arith.constant 0 : index
    %c0_43 = arith.constant 0 : index
    %118 = vector.load %arg4[%c0_41, %c2, %c0_42, %c0_43] : memref<1x4x16x16xf32, #tpu.memory_space<vmem>>, vector<1x1x16x16xf32>
    %119 = vector.shape_cast %118 : vector<1x1x16x16xf32> to vector<16x16xf32>
    %120 = vector.shape_cast %117 : vector<16x16xf32> to vector<1x1x16x16xf32>
    tpu.vector_store %arg4[%c0_41, %c2, %c0_42, %c0_43], %120 {strides = array<i32>} : memref<1x4x16x16xf32, #tpu.memory_space<vmem>>, vector<1x1x16x16xf32>,
    %121 = vector.extract_strided_slice %3 {offsets = [0, 24], sizes = [16, 8], strides = [1, 1]} : vector<16x32xf32> to vector<16x8xf32>
    %cst_44 = arith.constant dense<0.000000e+00> : vector<16x16xf32>
    %122 = tpu.matmul %121, %121, %cst_44 {dimension_numbers = #tpu.dot_dimension_numbers<[1], [1], [0], [0], [0, 0, 1, 0], [], []>} : vector<16x8xf32>, vector<16x8xf32>, vector<16x16xf32> -> vector<16x16xf32>
    %cst_45 = arith.constant 0.353553385 : f32
    %123 = vector.broadcast %cst_45 : f32 to vector<16x16xf32>
    %124 = arith.mulf %123, %122 : vector<16x16xf32>
    %cst_46 = arith.constant 0xFF800000 : f32
    %125 = vector.broadcast %cst_46 : f32 to vector<16x16xf32>
    %126 = arith.select %12, %125, %124 : vector<16x16xi1>, vector<16x16xf32>
    %cst_47 = arith.constant dense<0xFF800000> : vector<16xf32>
    %127 = vector.multi_reduction <maximumf>, %126, %cst_47 [1] : vector<16x16xf32> to vector<16xf32>
    %128 = vector.shape_cast %127 : vector<16xf32> to vector<16x1xf32>
    %129 = vector.broadcast %128 : vector<16x1xf32> to vector<16x16xf32>
    %130 = arith.subf %126, %129 : vector<16x16xf32>
    %131 = math.exp %130 : vector<16x16xf32>
    %cst_48 = arith.constant dense<0.000000e+00> : vector<16xf32>
    %132 = vector.multi_reduction <add>, %131, %cst_48 [1] : vector<16x16xf32> to vector<16xf32>
    %133 = vector.shape_cast %132 : vector<16xf32> to vector<16x1xf32>
    %134 = tpu.reciprocal %133 {approx = true} : vector<16x1xf32> -> vector<16x1xf32>
    %135 = vector.broadcast %134 : vector<16x1xf32> to vector<16x16xf32>
    %136 = arith.mulf %131, %135 : vector<16x16xf32>
    %137 = tpu.transpose %136, [1, 0] : vector<16x16xf32> -> vector<16x16xf32>
    %138 = arith.addf %136, %137 : vector<16x16xf32>
    %cst_49 = arith.constant 5.000000e-01 : f32
    %139 = vector.broadcast %cst_49 : f32 to vector<16x16xf32>
    %140 = arith.mulf %139, %138 : vector<16x16xf32>
    %cst_50 = arith.constant dense<0.000000e+00> : vector<16xf32>
    %141 = vector.multi_reduction <add>, %140, %cst_50 [1] : vector<16x16xf32> to vector<16xf32>
    %142 = vector.shape_cast %141 : vector<16xf32> to vector<16x1xf32>
    %cst_51 = arith.constant 0.000000e+00 : f32
    %143 = vector.shape_cast %142 : vector<16x1xf32> to vector<16x1xf32>
    %144 = vector.broadcast %143 : vector<16x1xf32> to vector<16x16xf32>
    %145 = vector.broadcast %cst_51 : f32 to vector<16x16xf32>
    %146 = arith.select %12, %144, %145 : vector<16x16xi1>, vector<16x16xf32>
    %147 = math.rsqrt %142 : vector<16x1xf32>
    %148 = arith.subf %146, %140 : vector<16x16xf32>
    %149 = vector.broadcast %147 : vector<16x1xf32> to vector<16x16xf32>
    %150 = arith.mulf %149, %148 : vector<16x16xf32>
    %151 = tpu.transpose %147, [1, 0] : vector<16x1xf32> -> vector<1x16xf32>
    %152 = vector.broadcast %151 : vector<1x16xf32> to vector<16x16xf32>
    %153 = arith.mulf %150, %152 : vector<16x16xf32>
    %c0_52 = arith.constant 0 : index
    %c3 = arith.constant 3 : index
    %c0_53 = arith.constant 0 : index
    %c0_54 = arith.constant 0 : index
    %154 = vector.load %arg4[%c0_52, %c3, %c0_53, %c0_54] : memref<1x4x16x16xf32, #tpu.memory_space<vmem>>, vector<1x1x16x16xf32>
    %155 = vector.shape_cast %154 : vector<1x1x16x16xf32> to vector<16x16xf32>
    %156 = vector.shape_cast %153 : vector<16x16xf32> to vector<1x1x16x16xf32>
    tpu.vector_store %arg4[%c0_52, %c3, %c0_53, %c0_54], %156 {strides = array<i32>} : memref<1x4x16x16xf32, #tpu.memory_space<vmem>>, vector<1x1x16x16xf32>,
    return
  }
  func.func @transform_0(%arg0: i32) -> (i32, i32, i32) {
    %c0_i32 = arith.constant 0 : i32
    %c0_i32_0 = arith.constant 0 : i32
    %c0_i32_1 = arith.constant 0 : i32
    return %arg0, %c0_i32, %c0_i32_0 : i32, i32, i32
  }
  func.func @transform_1(%arg0: i32) -> (i32, i32) {
    %c0_i32 = arith.constant 0 : i32
    %c0_i32_0 = arith.constant 0 : i32
    %c0_i32_1 = arith.constant 0 : i32
    return %c0_i32, %c0_i32_0 : i32, i32
  }
  func.func @transform_2(%arg0: i32) -> (i32, i32) {
    %c0_i32 = arith.constant 0 : i32
    %c0_i32_0 = arith.constant 0 : i32
    %c0_i32_1 = arith.constant 0 : i32
    return %c0_i32, %c0_i32_0 : i32, i32
  }
  func.func @transform_3(%arg0: i32) -> (i32, i32, i32, i32) {
    %c0_i32 = arith.constant 0 : i32
    %c0_i32_0 = arith.constant 0 : i32
    %c0_i32_1 = arith.constant 0 : i32
    %c0_i32_2 = arith.constant 0 : i32
    return %arg0, %c0_i32, %c0_i32_0, %c0_i32_1 : i32, i32, i32, i32
  }
  func.func @transform_4(%arg0: i32) -> (i32, i32, i32) {
    %c0_i32 = arith.constant 0 : i32
    %c0_i32_0 = arith.constant 0 : i32
    %c0_i32_1 = arith.constant 0 : i32
    return %arg0, %c0_i32, %c0_i32_0 : i32, i32, i32
  }
}

</mosaic_0001>

<bundles_post_ra>
// kernel: tpu_custom_call.1
= control target key start
LH: loop header
LB: loop body
LE: loop exit
PB: predicated region body
PF: predicated region fallthrough
CT: control target
= control target key end

     0   :  { %10 = vsyncpa [#allocation3], 0  ;;  %s2217_s0 = inlined_call_operand.hbm [shape: bf16[2,16,32], index: 0, kind: input, shape index: {}]   ;;  %s2218_s1 = inlined_call_operand.hbm [shape: bf16[32,32], index: 1, kind: input, shape index: {}]   ;;  %s2219_s2 = inlined_call_operand.hbm [shape: bf16[32,32], index: 2, kind: input, shape index: {}]   ;;  %s2220_s3 = inlined_call_operand.hbm [shape: f32[2,4,16,16], index: 3, kind: output, shape index: {0}]   ;;  %s2221_s4 = inlined_call_operand.hbm [shape: bf16[2,16,32], index: 4, kind: output, shape index: {1}]  }
   0x1   :  { %12 = vsyncpa [#allocation3 + $0x1], 0 }
   0x2   :  { %13 = vsyncpa [#allocation6], 0 }
   0x3   :  { %14 = vsyncpa [#allocation4], 0 }
   0x4   :  { %16 = vsyncpa [#allocation4 + $0x1], 0 }
   0x5   :  { %17 = vsyncpa [#allocation10], 0 }
   0x6   :  { %19 = vsyncpa [#allocation10 + $0x1], 0  ;;  %s1847_s15 = smov 0   ;;  %s1849_s16 = smov 0  }
   0x7   :  { %s1851_s17 = smov 0   ;;  %s1853_s18 = smov 0  }
   0x8 LB: > { %s1868_s19 = sadd.s32 4294967295, %s1804_s18   ;;  %s1366_s20 = sadd.s32 4294967294, %s1804_s18   ;;  %s1804_s18 = sphi %s1853_s18, %s2246_s18   ;;  %s1800_s17 = sphi %s1851_s17, %s2245_s17   ;;  %s1796_s16 = sphi %s1849_s16, %s2244_s16   ;;  %s1792_s15 = sphi %s1847_s15, %s2243_s15  }
   0x9   : > { %p45_p0 = scmp.ne.s32.totalorder %s1796_s16, %s1792_s15  ;;  %p2222_p1 = scmp.eq.s32.totalorder %s1868_s19, 0 }
   0xa   : > { %p111_p2 = scmp.eq.s32.totalorder %s1868_s19, 1  ;;  %p117_p3 = scmp.eq.s32.totalorder %s1366_s20, 1 }
   0xb   : > { %p1877_p4 = por %p2222_p1, %p45_p0  ;;  %p1367_p5 = scmp.ge.s32.totalorder %s1804_s18, 1 }
   0xc   : > { %p1882_p6 = por %p117_p3, %p45_p0  ;;  %p150_p7 = scmp.lt.s32.totalorder %s1804_s18, 3 }
   0xd   : > { %s2226_s21 = scalar_select %p1877_p4, 1, 0 }
   0xe   : > { %s2227_s22 = scalar_select %p1882_p6, 1, 0 }
   0xf   : > { %p1887_p8 = pnand %p1367_p5, %p150_p7  ;;  %s1806_s24 = smov [#allocation5]  }
  0x10   : > { %s162_s25 = sshll.u32 %s1806_s24, 4  ;;  %s1807_s27 = smov [#allocation7]   ;;  %s163_s25 = int_to_ptr.vmem [resolvable:$true] %s162_s25 }
  0x11   : > { %s2228_s23 = scalar_select %p1887_p8, 1, 0 }
  0x12   : > { %p1504_p9 = pneg %p1887_p8  ;;  %s175_s28 = sshll.u32 %s1807_s27, 4  ;;  %s176_s28 = int_to_ptr.vmem [resolvable:$true] %s175_s28 }
  0x13   : > { %s1637_s29 = scalar_lea.vmem %s163_s25, 256  ;;  %p1645_p5 = scmp.lt.s32.totalorder %s163_s25, %s163_s25 }
  0x14   : > { %p1896_p11 = pnand %p1504_p9, %p2222_p1  ;;  %p1638_p13 = scmp.ne.s32.totalorder %s163_s25, %s1637_s29 }
  0x15   : > { %p1646_p7 = scmp.lt.s32.totalorder %s1637_s29, %s1637_s29 }
  0x16   : > { %p1628_p12 = pneg %p1896_p11 }
  0x17   : > { %p1647_p10 = por %p1646_p7, %p1645_p5 }
  0x18   : > { %p1640_p0 = pnand %p1638_p13, %p1628_p12 }
  0x1a   : > { %p1641_p3 = pneg %p1640_p0 }
  0x1c   : > { %p1648_p9 = pnand %p1647_p10, %p1641_p3 }
  0x1e   : > { %1651 = shalt.err (!%p1648_p9)
}
  0x1f   : > { %s1808_s30 = smov 64   ;;  %s1809_s5 = smov 4  }
  0x20   : > { %1507 = dma.hbm_to_vmem [thread:$0]  (!%p1896_p11), %s2218_s1, 256, %s163_s25, [#allocation6], %s1808_s30, %s1808_s30, %s1809_s5  }
  0x21   : > { %s1663_s8 = scalar_lea.vmem %s176_s28, 256  ;;  %p1671_p10 = scmp.lt.s32.totalorder %s176_s28, %s176_s28 }
  0x22   : > { %p1664_p13 = scmp.ne.s32.totalorder %s176_s28, %s1663_s8  ;;  %p1672_p3 = scmp.lt.s32.totalorder %s1663_s8, %s1663_s8 }
  0x24   : > { %p1666_p0 = pnand %p1664_p13, %p1628_p12  ;;  %p1673_p7 = por %p1672_p3, %p1671_p10 }
  0x26   : > { %p1667_p5 = pneg %p1666_p0 }
  0x28   : > { %p1674_p9 = pnand %p1673_p7, %p1667_p5 }
  0x2a   : > { %1677 = shalt.err (!%p1674_p9)
}
  0x2b   : > { %1510 = dma.hbm_to_vmem [thread:$0]  (!%p1896_p11), %s2219_s2, 256, %s176_s28, [#allocation6], %s1808_s30, %s1808_s30, %s1809_s5  }
  0x2c   : > { %s1925_s11 = sadd.s32 1, %s1804_s18   ;;  %s32_s12 = sadd.s32 1, %s1800_s17 }
  0x2d   : > { %s29_s13 = ssub.s32 %s1804_s18, %s1925_s11  ;;  %p39_p12 = scmp.ne.s32.totalorder %s1800_s17, %s1796_s16 }
  0x2e   : > { %p30_p13 = scmp.eq.s32.totalorder %s29_s13, 0  ;;  %p40_p0 = scmp.eq.s32.totalorder %s1804_s18, 0 }
  0x2f   : > { %p1935_p5 = por %p111_p2, %p39_p12  ;;  %p1524_p10 = scmp.lt.s32.totalorder %s1804_s18, 2 }
  0x30   : > { %s1941_s20 = scalar_select %p30_p13, %s1800_s17, %s32_s12  }
  0x31   : > { %s2230_s14 = scalar_select %p1935_p5, 1, 0 }
  0x32   : > { %p41_p3 = por %p40_p0, %p39_p12  ;;  %s189_s24 = sand.u32 1, %s1800_s17  }
  0x33   : > { %s1371_s25 = sshll.u32 %s189_s24, 3  ;;  %s1419_s26 = sshll.u32 %s1804_s18, 7 }
  0x34   : > { %s1948_s29 = scalar_lea.hbm %s2217_s0, %s1419_s26  ;;  %s193_s6 = scalar_lea.vmem [#allocation2], %s1371_s25 }
  0x35   : > { %s200_s7 = sshll.u32 %s193_s6, 4  ;;  %p1952_p2 = pnand %p1524_p10, %p41_p3  ;;  %s1950_s7 = int_to_ptr.vmem [resolvable:$true] %s200_s7 }
  0x36   : > { %s1956_s9 = scalar_lea.sflag [#allocation3], %s189_s24  ;;  %s1678_s10 = scalar_lea.hbm %s1948_s29, 128 }
  0x37   : > { %p1679_p11 = scmp.ne.s32.totalorder %s1948_s29, %s1678_s10  ;;  %p1680_p7 = pneg %p1952_p2 }
  0x38   : > { %s1683_s25 = scalar_lea.hbm %s2217_s0, 256  ;;  %p1684_p13 = scmp.lt.s32.totalorder %s1948_s29, %s2217_s0 }
  0x39   : > { %p1681_p9 = pnand %p1680_p7, %p1679_p11  ;;  %p1685_p0 = scmp.lt.s32.totalorder %s1683_s25, %s1678_s10 }
  0x3b   : > { %p1682_p12 = pneg %p1681_p9  ;;  %p1686_p10 = por %p1685_p0, %p1684_p13 }
  0x3d   : > { %p1687_p3 = pnand %p1686_p10, %p1682_p12 }
  0x3f   : > { %1690 = shalt.err (!%p1687_p3)
}
  0x40   : > { %s1691_s24 = scalar_lea.vmem %s1950_s7, 128  ;;  %s1810_s28 = smov [#allocation2]  }
  0x41   : > { %p1692_p1 = scmp.ne.s32.totalorder %s1950_s7, %s1691_s24  ;;  %s1696_s6 = sshll.u32 %s1810_s28, 4  ;;  %s1697_s6 = int_to_ptr.vmem [resolvable:$false] %s1696_s6 }
  0x42   : > { %s1698_s12 = scalar_lea.vmem %s1697_s6, 256  ;;  %p1699_p9 = scmp.lt.s32.totalorder %s1950_s7, %s1697_s6 }
  0x43   : > { %p1694_p6 = pnand %p1692_p1, %p1680_p7  ;;  %p1700_p5 = scmp.lt.s32.totalorder %s1698_s12, %s1691_s24 }
  0x45   : > { %p1695_p11 = pneg %p1694_p6  ;;  %p1701_p4 = por %p1700_p5, %p1699_p9 }
  0x47   : > { %p1702_p8 = pnand %p1701_p4, %p1695_p11 }
  0x49   : > { %1705 = shalt.err (!%p1702_p8)
}
  0x4a   : > { %1514 = dma.hbm_to_vmem [thread:$0]  (!%p1952_p2), %s1948_s29, 128, %s1950_s7, %s1956_s9, %s1808_s30, %s1808_s30, %s1809_s5  }
  0x4b   : > { %p2232_p1 = scmp.ne.s32.totalorder %s2228_s23, 0 }
  0x4c   : > { %s1983_s10 = sand.u32 (!%p2232_p1), 1, %s1796_s16   ;;  %p2233_p4 = scmp.ne.s32.totalorder (!%p2232_p1), %s2226_s21, 0 }
  0x4d   : > { %212 = sbr.rel (%p2232_p1) target bundleno = 1558 (0x616), region = 32  ;;  %s1375_s13 = sshll.u32 (!%p2232_p1), %s1983_s10, 3 }
  0x4e   : > { %s215_s25 = scalar_lea.sflag (!%p2232_p1), [#allocation3], %s1983_s10  ;;  %s218_s8 = scalar_lea.vmem (!%p2232_p1), [#allocation2], %s1375_s13 }
  0x52   : > { %1775 = dma.done.wait (%p2233_p4), %s215_s25, 128  }
  0x53   : > { %1777 = vsyncadd (%p2233_p4), %s215_s25, 4294967168  ;;  %p2234_p6 = scmp.eq.s32.totalorder %s1868_s19, 0 }
  0x55   : > { %1779 = dma.done.wait (%p2234_p6), [#allocation6], 512   ;;  %p2235_p8 = pmov %p2234_p6 }
  0x56   : > { %v1811_v0 = vmov 0.0   ;;  %vm1812_vm0 = vmmov 0   ;;  %vm278_vm1 = vcmask 261120   ;;  %v1573_v1 = vld [vmem:[#allocation5 + $0x8] sm:$0xff]   ;;  %v1574_v3 = vld [vmem:[#allocation5] sm:$0xff]   ;;  %v1575_v5 = vld [vmem:[%s218_s8] sm:$0xff]   ;;  %v401_v26 = vlaneseq }
  0x57   : > { %1781 = vsyncadd (%p2235_p8), [#allocation6], 4294966784  ;;  %1446 = vmatprep.subr.bf16.mxu0 %v1811_v0  ;;  %1450 = vmatprep.mubr.msk.bf16.mxu0 %vm1812_vm0, %v1811_v0  ;;  %v286_v2 = vsel %vm278_vm1, %v1573_v1, 0  ;;  %v283_v4 = vsel %vm278_vm1, %v1574_v3, 0  ;;  %v1576_v6 = vld [vmem:[#allocation7 + $0x8] sm:$0xff]   ;;  %v1577_v8 = vld [vmem:[#allocation7] sm:$0xff]  }
  0x58   : > { %1454 = vmatprep.subr.bf16.mxu1 %v1811_v0  ;;  %1458 = vmatprep.mubr.msk.bf16.mxu1 %vm1812_vm0, %v1811_v0  ;;  %v347_v7 = vsel %vm278_vm1, %v1576_v6, 0  ;;  %v344_v9 = vsel %vm278_vm1, %v1577_v8, 0  ;;  %vm408_vm2 = vcmask 64512   ;;  %s1813_s21 = smov 112   ;;  %s1814_s23 = smov 120   ;;  %vm398_vm3 = vcmask 257024  }
  0x59   : > { %1447 = vmatpush3.bf16.xpose.msra.mxu0 %v286_v2  ;;  %1455 = vmatpush3.bf16.xpose.msra.mxu1 %v347_v7  ;;  %s1815_s30 = smov 104   ;;  %s2011_s5 = scalar_lea.vmem [#allocation9], %s1375_s13  ;;  %v2033_v27 = vshrl.u32 %v401_v26, 7  ;;  %v405_v29 = vand.u32 127, %v401_v26  ;;  %vm494_vm5 = vcmask 130048  }
  0x5a   : > { %1448 = vmatprep.subr.bf16.mxu0 %v1811_v0  ;;  %1456 = vmatprep.subr.bf16.mxu1 %v1811_v0  ;;  %s1378_s29 = sshll.u32 %s1983_s10, 6  ;;  %s1242_s9 = sshll.u32 %s2011_s5, 4  ;;  %s2128_s9 = int_to_ptr.vmem [resolvable:$true] %s1242_s9 }
  0x5b   : > { %v403_v28 = vadd.s32 8, %v2033_v27  ;;  %vm2041_vm6 = vcmp.eq.s32.totalorder %v2033_v27, %v405_v29  ;;  %s2108_s7 = scalar_lea.vmem [#allocation8], %s1378_s29  ;;  %s1423_s26 = sshll.u32 %s1868_s19, 7 }
  0x5c   : > { %s2134_s28 = scalar_lea.hbm %s2221_s4, %s1423_s26  ;;  %s1213_s6 = scalar_lea.sflag [#allocation10], %s1983_s10 }
  0x5d   : > { %vm2036_vm4 = vcmp.eq.s32.totalorder %v403_v28, %v405_v29  ;;  %s1706_s12 = scalar_lea.vmem %s2128_s9, 128  ;;  %p2240_p2 = scmp.ne.s32.totalorder %s2230_s14, 0 }
  0x5e   : > { %p1707_p5 = scmp.ne.s32.totalorder %s2128_s9, %s1706_s12  ;;  %s1816_s13 = smov [#allocation9]  }
  0x5f   : > { %s1710_s25 = sshll.u32 %s1816_s13, 4  ;;  %s1711_s25 = int_to_ptr.vmem [resolvable:$false] %s1710_s25 }
  0x60   : > { %p1708_p7 = pnand %p1707_p5, %p2240_p2  ;;  %s1712_s8 = scalar_lea.vmem %s1711_s25, 256 }
  0x61   : > { %1449 = vmatpush3.bf16.xpose.msra.mxu0 %v283_v4  ;;  %1457 = vmatpush3.bf16.xpose.msra.mxu1 %v344_v9  ;;  %p1713_p13 = scmp.lt.s32.totalorder %s2128_s9, %s1711_s25  ;;  %p1714_p0 = scmp.lt.s32.totalorder %s1712_s8, %s1706_s12 }
  0x62   : > { %p1709_p12 = pneg %p1708_p7 }
  0x63   : > { %p1715_p10 = por %p1714_p0, %p1713_p13 }
  0x65   : > { %p1716_p3 = pnand %p1715_p10, %p1709_p12 }
  0x68   : > { %1451 = vmatmul.mubr.msk.bf16.vlgmr.msra.gmra.mxu0 %vm278_vm1, %v1575_v5  ;;  %1459 = vmatmul.mubr.msk.bf16.vlgmr.msra.gmra.mxu1 %vm278_vm1, %v1575_v5 }
 0x128   : > { %v322_v10 = vpop.f32.mrf.mxu0  ;;  %v383_v14 = vpop.f32.mrf.mxu1 }
 0x129   : > { %1466 = vmatprep.mubr.msk.f32.mxu0 %vm408_vm2, %v322_v10  ;;  %v1420_v15 = vpack.c.bf16 %v383_v14, %v383_v14 }
 0x12a   : > { %v1452_v11 = vpop.f32.mrf.mxu0  ;;  %v1460_v16 = vpop.f32.mrf.mxu1 }
 0x12b   : > { %399 = vst.msk [vmem:[%s2011_s5] sm:$0xf] %vm398_vm3, %v1420_v15 }
 0x12c   : > { %v325_v12 = vpop.f32.mrf.mxu0  ;;  %v386_v17 = vpop.f32.mrf.mxu1 }
 0x12d   : > { %809 = vrot.lane.b32.xlu1 %v325_v12, %s1813_s21  ;;  %609 = vrot.lane.b32.xlu0 %v325_v12, %s1814_s23  ;;  %v1421_v18 = vpack.c.bf16 %v386_v17, %v386_v17 }
 0x12e   : > { %1462 = vmatprep.subr.msk.mxu0 %vm408_vm2, %v325_v12  ;;  %v1453_v13 = vpop.f32.mrf.mxu0  ;;  %v1461_v19 = vpop.f32.mrf.mxu1 }
 0x12f   : > { %1463 = vmatpush3.xpose.msk.msra.mxu0 %vm408_vm2, %v325_v12  ;;  %400 = vst.msk [vmem:[%s2011_s5 + $0x4] sm:$0xf] %vm398_vm3, %v1421_v18 }
 0x130   : > { %1464 = vmatprep.subr.msk.mxu0 %vm408_vm2, %v322_v10 }
 0x131   : > { %1009 = vrot.lane.b32.xlu1 %v325_v12, %s1815_s30  ;;  %607 = vrot.lane.b32.xlu0 %v322_v10, %s1814_s23 }
 0x133   : > { %1465 = vmatpush3.xpose.msk.msra.mxu0 %vm408_vm2, %v322_v10 }
 0x135   : > { %1007 = vrot.lane.b32.xlu1 %v322_v10, %s1815_s30  ;;  %807 = vrot.lane.b32.xlu0 %v322_v10, %s1813_s21 }
 0x136   : > { %1467 = vmatmul.mubr.msk.f32.vlgmr.msra.gmra.mxu0 %vm408_vm2, %v325_v12 }
 0x19f   : > { %v810_v20 = vpop.permute.xlu1 %809  ;;  %v610_v21 = vpop.permute.xlu0 %609 }
 0x1a0   : > { %1469 = vmatprep.subr.msk.mxu1 %vm408_vm2, %v610_v21  ;;  %1476 = vmatprep.subr.msk.mxu0 %vm408_vm2, %v810_v20 }
 0x1a1   : > { %1470 = vmatpush3.xpose.msk.msra.mxu1 %vm408_vm2, %v610_v21  ;;  %1477 = vmatpush3.xpose.msk.msra.mxu0 %vm408_vm2, %v810_v20 }
 0x1a3   : > { %v1010_v22 = vpop.permute.xlu1 %1009  ;;  %v608_v23 = vpop.permute.xlu0 %607 }
 0x1a4   : > { %1471 = vmatprep.subr.msk.mxu1 %vm408_vm2, %v608_v23  ;;  %1473 = vmatprep.mubr.msk.f32.mxu1 %vm408_vm2, %v608_v23 }
 0x1a5   : > { %1472 = vmatpush3.xpose.msk.msra.mxu1 %vm408_vm2, %v608_v23 }
 0x1a6   : > { %1483 = vmatprep.subr.msk.mxu1 %vm408_vm2, %v1010_v22 }
 0x1a7   : > { %v1008_v24 = vpop.permute.xlu1 %1007  ;;  %v808_v25 = vpop.permute.xlu0 %807 }
 0x1a8   : > { %1474 = vmatmul.mubr.msk.f32.vlgmr.msra.gmra.mxu1 %vm408_vm2, %v610_v21  ;;  %1478 = vmatprep.subr.msk.mxu0 %vm408_vm2, %v808_v25 }
 0x1a9   : > { %1480 = vmatprep.mubr.msk.f32.mxu0 %vm408_vm2, %v808_v25  ;;  %1479 = vmatpush3.xpose.msk.msra.mxu0 %vm408_vm2, %v808_v25 }
 0x1aa   : > { %1484 = vmatpush3.xpose.msk.msra.mxu1 %vm408_vm2, %v1010_v22  ;;  %1487 = vmatprep.mubr.msk.f32.mxu1 %vm408_vm2, %v1008_v24 }
 0x1ab   : > { %1485 = vmatprep.subr.msk.mxu1 %vm408_vm2, %v1008_v24 }
 0x1ac   : > { %1481 = vmatmul.mubr.msk.f32.vlgmr.msra.gmra.mxu0 %vm408_vm2, %v810_v20 }
 0x1ae   : > { %1486 = vmatpush3.xpose.msk.msra.mxu1 %vm408_vm2, %v1008_v24 }
 0x1b1   : > { %1488 = vmatmul.mubr.msk.f32.vlgmr.msra.gmra.mxu1 %vm408_vm2, %v1010_v22 }
 0x1f6   : > { %v1468_v30 = vpop.f32.mrf.mxu0 }
 0x1f7   : > { %v491_v32 = vmul.f32 0.35355338, %v1468_v30 }
 0x1f8   : > { %v481_v33 = vpop.f32.mrf.mxu0 }
 0x1f9   : > { %v490_v35 = vmul.f32 0.35355338, %v481_v33  ;;  %v493_v36 = vsel %vm2036_vm4, -inf, %v491_v32 }
 0x1fa   : > { %v498_v37 = vsel %vm494_vm5, %v493_v36, -inf }
 0x1fb   : > { %499 = vmax.xlane.f32.xlu1 %v498_v37  ;;  %v492_v38 = vsel %vm2041_vm6, -inf, %v490_v35 }
 0x1fc   : > { %v495_v39 = vsel %vm494_vm5, %v492_v38, -inf }
 0x1fd   : > { %496 = vmax.xlane.f32.xlu0 %v495_v39 }
 0x268   : > { %v1475_v40 = vpop.f32.mrf.mxu1 }
 0x269   : > { %v691_v41 = vmul.f32 0.35355338, %v1475_v40 }
 0x26a   : > { %v681_v42 = vpop.f32.mrf.mxu1 }
 0x26b   : > { %v690_v43 = vmul.f32 0.35355338, %v681_v42  ;;  %v693_v44 = vsel %vm2036_vm4, -inf, %v691_v41 }
 0x26c   : > { %v1482_v45 = vpop.f32.mrf.mxu0  ;;  %v697_v46 = vsel %vm494_vm5, %v693_v44, -inf }
 0x26d   : > { %698 = vmax.xlane.f32.xlu1 %v697_v46  ;;  %v692_v47 = vsel %vm2041_vm6, -inf, %v690_v43  ;;  %v891_v56 = vmul.f32 0.35355338, %v1482_v45 }
 0x26e   : > { %v881_v48 = vpop.f32.mrf.mxu0  ;;  %v694_v50 = vsel %vm494_vm5, %v692_v47, -inf }
 0x26f   : > { %v890_v49 = vmul.f32 0.35355338, %v881_v48  ;;  %v893_v62 = vsel %vm2036_vm4, -inf, %v891_v56 }
 0x270   : > { %v897_v63 = vsel %vm494_vm5, %v893_v62, -inf }
 0x271   : > { %v1489_v51 = vpop.f32.mrf.mxu1  ;;  %695 = vmax.xlane.f32.xlu1 %v694_v50  ;;  %v892_v52 = vsel %vm2041_vm6, -inf, %v890_v49 }
 0x272   : > { %v1091_v53 = vmul.f32 0.35355338, %v1489_v51  ;;  %v894_v54 = vsel %vm494_vm5, %v892_v52, -inf }
 0x273   : > { %v1081_v55 = vpop.f32.mrf.mxu1  ;;  %895 = vmax.xlane.f32.xlu0 %v894_v54 }
 0x274   : > { %v1090_v57 = vmul.f32 0.35355338, %v1081_v55  ;;  %v1093_v58 = vsel %vm2036_vm4, -inf, %v1091_v53 }
 0x275   : > { %v1097_v60 = vsel %vm494_vm5, %v1093_v58, -inf }
 0x276   : > { %v1092_v59 = vsel %vm2041_vm6, -inf, %v1090_v57 }
 0x277   : > { %v1094_v61 = vsel %vm494_vm5, %v1092_v59, -inf  ;;  %1098 = vmax.xlane.f32.xlu0 %v1097_v60 }
 0x278   : > { %1095 = vmax.xlane.f32.xlu1 %v1094_v61 }
 0x27c   : > { %898 = vmax.xlane.f32.xlu1 %v897_v63 }
 0x284   : > { %v500_v0 = vpop.xlane.xlu1 %499 }
 0x285   : > { %v502_v1 = vsub.f32 %v493_v36, %v500_v0 }
 0x286   : > { %v497_v2 = vpop.xlane.xlu0 %496 }
 0x287   : > { %v505_v3 = vmul.f32 1.442695, %v502_v1  ;;  %v501_v4 = vsub.f32 %v492_v38, %v497_v2 }
 0x289   : > { %1578 = vpow2.f32 %v505_v3  ;;  %v503_v5 = vmul.f32 1.442695, %v501_v4 }
 0x28b   : > { %1580 = vpow2.f32 %v503_v5 }
 0x296   : > { %v1579_v6 = vpop.eup %1578 }
 0x297   : > { %v510_v7 = vsel %vm494_vm5, %v1579_v6, 0.0 }
 0x298   : > { %v1581_v8 = vpop.eup %1580  ;;  %511 = vadd.xlane.f32.xlu0 %v510_v7 }
 0x299   : > { %v507_v9 = vsel %vm494_vm5, %v1581_v8, 0.0 }
 0x29c   : > { %508 = vadd.xlane.f32.xlu0 %v507_v9 }
 0x2f6   : > { %v699_v10 = vpop.xlane.xlu1 %698 }
 0x2f7   : > { %v701_v11 = vsub.f32 %v693_v44, %v699_v10 }
 0x2f9   : > { %v704_v12 = vmul.f32 1.442695, %v701_v11 }
 0x2fa   : > { %v696_v13 = vpop.xlane.xlu1 %695 }
 0x2fb   : > { %1582 = vpow2.f32 %v704_v12  ;;  %v700_v14 = vsub.f32 %v692_v47, %v696_v13 }
 0x2fc   : > { %v896_v16 = vpop.xlane.xlu0 %895 }
 0x2fd   : > { %v702_v15 = vmul.f32 1.442695, %v700_v14  ;;  %v900_v18 = vsub.f32 %v892_v52, %v896_v16 }
 0x2ff   : > { %1584 = vpow2.f32 %v702_v15  ;;  %v902_v23 = vmul.f32 1.442695, %v900_v18 }
 0x300   : > { %v1099_v19 = vpop.xlane.xlu0 %1098 }
 0x301   : > { %v1096_v17 = vpop.xlane.xlu1 %1095  ;;  %v1101_v24 = vsub.f32 %v1093_v58, %v1099_v19 }
 0x302   : > { %v1100_v29 = vsub.f32 %v1092_v59, %v1096_v17 }
 0x303   : > { %v1104_v30 = vmul.f32 1.442695, %v1101_v24 }
 0x304   : > { %v1102_v33 = vmul.f32 1.442695, %v1100_v29 }
 0x305   : > { %v899_v20 = vpop.xlane.xlu1 %898 }
 0x306   : > { %v901_v21 = vsub.f32 %v893_v62, %v899_v20 }
 0x308   : > { %v1583_v22 = vpop.eup %1582  ;;  %v904_v25 = vmul.f32 1.442695, %v901_v21 }
 0x309   : > { %v709_v26 = vsel %vm494_vm5, %v1583_v22, 0.0 }
 0x30a   : > { %1586 = vpow2.f32 %v904_v25  ;;  %710 = vadd.xlane.f32.xlu0 %v709_v26 }
 0x30b   : > { %1588 = vpow2.f32 %v902_v23 }
 0x30c   : > { %v1585_v28 = vpop.eup %1584  ;;  %1590 = vpow2.f32 %v1104_v30 }
 0x30d   : > { %v706_v32 = vsel %vm494_vm5, %v1585_v28, 0.0  ;;  %1592 = vpow2.f32 %v1102_v33 }
 0x30e   : > { %707 = vadd.xlane.f32.xlu1 %v706_v32 }
 0x317   : > { %v1587_v35 = vpop.eup %1586 }
 0x318   : > { %v909_v36 = vsel %vm494_vm5, %v1587_v35, 0.0  ;;  %v1589_v37 = vpop.eup %1588 }
 0x319   : > { %910 = vadd.xlane.f32.xlu0 %v909_v36  ;;  %v906_v38 = vsel %vm494_vm5, %v1589_v37, 0.0  ;;  %v1591_v39 = vpop.eup %1590 }
 0x31a   : > { %v1109_v40 = vsel %vm494_vm5, %v1591_v39, 0.0  ;;  %v1593_v41 = vpop.eup %1592 }
 0x31b   : > { %v1106_v42 = vsel %vm494_vm5, %v1593_v41, 0.0 }
 0x31d   : > { %907 = vadd.xlane.f32.xlu0 %v906_v38 }
 0x321   : > { %1110 = vadd.xlane.f32.xlu0 %v1109_v40  ;;  %v512_v43 = vpop.xlane.xlu0 %511 }
 0x325   : > { %1107 = vadd.xlane.f32.xlu0 %v1106_v42  ;;  %v509_v44 = vpop.xlane.xlu0 %508 }
 0x326   : > { %1594 = vrcp.f32 %v509_v44 }
 0x327   : > { %1596 = vrcp.f32 %v512_v43 }
 0x333   : > { %v1595_v45 = vpop.eup %1594 }
 0x334   : > { %v515_v46 = vmul.f32 %v1595_v45, %v1581_v8  ;;  %v1597_v47 = vpop.eup %1596 }
 0x335   : > { %v516_v48 = vmul.f32 %v1597_v47, %v1579_v6 }
 0x341   : > { %517 = vxpose.xlu1.b32.start [1/2] (short) (narrow) %v515_v46, 16 }
 0x345   : > { %518 = vxpose.xlu1.b32.end [2/2] (short) (narrow) %v516_v48, 16 }
 0x393   : > { %v711_v49 = vpop.xlane.xlu0 %710 }
 0x397   : > { %v708_v50 = vpop.xlane.xlu1 %707 }
 0x398   : > { %1598 = vrcp.f32 %v708_v50 }
 0x399   : > { %1600 = vrcp.f32 %v711_v49 }
 0x3a2   : > { %v911_v51 = vpop.xlane.xlu0 %910 }
 0x3a5   : > { %v1599_v52 = vpop.eup %1598 }
 0x3a6   : > { %v908_v53 = vpop.xlane.xlu0 %907  ;;  %v714_v54 = vmul.f32 %v1599_v52, %v1585_v28  ;;  %v1601_v55 = vpop.eup %1600 }
 0x3a7   : > { %1602 = vrcp.f32 %v908_v53  ;;  %v715_v56 = vmul.f32 %v1601_v55, %v1583_v22 }
 0x3a8   : > { %716 = vxpose.xlu1.b32.start [1/2] (short) (narrow) %v714_v54, 16  ;;  %1604 = vrcp.f32 %v911_v51 }
 0x3aa   : > { %v1111_v5 = vpop.xlane.xlu0 %1110 }
 0x3ac   : > { %717 = vxpose.xlu1.b32.end [2/2] (short) (narrow) %v715_v56, 16 }
 0x3ae   : > { %v1108_v6 = vpop.xlane.xlu0 %1107 }
 0x3af   : > { %1606 = vrcp.f32 %v1108_v6 }
 0x3b0   : > { %1608 = vrcp.f32 %v1111_v5 }
 0x3b4   : > { %v1603_v57 = vpop.eup %1602 }
 0x3b5   : > { %v914_v58 = vmul.f32 %v1603_v57, %v1589_v37  ;;  %v1605_v59 = vpop.eup %1604 }
 0x3b6   : > { %v915_v60 = vmul.f32 %v1605_v59, %v1587_v35 }
 0x3b7   : > { %916 = vxpose.xlu1.b32.start [1/2] (short) (narrow) %v914_v58, 16 }
 0x3bb   : > { %917 = vxpose.xlu1.b32.end [2/2] (short) (narrow) %v915_v60, 16 }
 0x3bc   : > { %v1607_v7 = vpop.eup %1606 }
 0x3bd   : > { %v533_v61 = vpop.trf.xlu1  ;;  %v1114_v8 = vmul.f32 %v1607_v7, %v1593_v41  ;;  %v1609_v9 = vpop.eup %1608 }
 0x3be   : > { %v549_v62 = vadd.f32 %v533_v61, %v515_v46  ;;  %v2079_v10 = vmul.f32 %v1609_v9, %v1591_v39 }
 0x3c0   : > { %v551_v63 = vmul.f32 0.5, %v549_v62 }
 0x3c1   : > { %v534_v0 = vpop.trf.xlu1 }
 0x3c2   : > { %v550_v1 = vadd.f32 %v534_v0, %v516_v48  ;;  %v553_v2 = vsel %vm494_vm5, %v551_v63, 0.0 }
 0x3c3   : > { %554 = vadd.xlane.f32.xlu0 %v553_v2 }
 0x3c4   : > { %v552_v3 = vmul.f32 0.5, %v550_v1  ;;  %v2103_v1 = vsub.s32 0, %v2033_v27 }
 0x3c6   : > { %v556_v4 = vsel %vm494_vm5, %v552_v3, 0.0 }
 0x3c7   : > { %557 = vadd.xlane.f32.xlu0 %v556_v4 }
 0x3f4   : > { %1116 = vxpose.xlu0.b32.start [1/2] (short) (narrow) %v1114_v8, 16 }
 0x3f8   : > { %1117 = vxpose.xlu0.b32.end [2/2] (short) (narrow) %v2079_v10, 16 }
 0x424   : > { %v732_v11 = vpop.trf.xlu1 }
 0x425   : > { %v748_v12 = vadd.f32 %v732_v11, %v714_v54 }
 0x427   : > { %v750_v13 = vmul.f32 0.5, %v748_v12 }
 0x428   : > { %v733_v14 = vpop.trf.xlu1 }
 0x429   : > { %v749_v15 = vadd.f32 %v733_v14, %v715_v56  ;;  %v752_v16 = vsel %vm494_vm5, %v750_v13, 0.0 }
 0x42a   : > { %753 = vadd.xlane.f32.xlu0 %v752_v16 }
 0x42b   : > { %v751_v17 = vmul.f32 0.5, %v749_v15 }
 0x42d   : > { %v755_v18 = vsel %vm494_vm5, %v751_v17, 0.0 }
 0x42e   : > { %756 = vadd.xlane.f32.xlu0 %v755_v18 }
 0x433   : > { %v932_v19 = vpop.trf.xlu1 }
 0x434   : > { %v948_v20 = vadd.f32 %v932_v19, %v914_v58 }
 0x436   : > { %v950_v21 = vmul.f32 0.5, %v948_v20 }
 0x437   : > { %v933_v22 = vpop.trf.xlu1 }
 0x438   : > { %v949_v23 = vadd.f32 %v933_v22, %v915_v60  ;;  %v952_v24 = vsel %vm494_vm5, %v950_v21, 0.0 }
 0x439   : > { %953 = vadd.xlane.f32.xlu1 %v952_v24 }
 0x43a   : > { %v951_v25 = vmul.f32 0.5, %v949_v23 }
 0x43c   : > { %v955_v26 = vsel %vm494_vm5, %v951_v25, 0.0 }
 0x43d   : > { %956 = vadd.xlane.f32.xlu0 %v955_v26 }
 0x44c   : > { %v555_v28 = vpop.xlane.xlu0 %554 }
 0x44d   : > { %1610 = vrsqrt.f32 %v555_v28  ;;  %v559_v30 = vsel %vm2041_vm6, %v555_v28, 0.0 }
 0x44e   : > { %v563_v32 = vsub.f32 %v559_v30, %v551_v63 }
 0x450   : > { %v558_v29 = vpop.xlane.xlu0 %557 }
 0x451   : > { %1612 = vrsqrt.f32 %v558_v29  ;;  %v560_v35 = vsel %vm2036_vm4, %v558_v29, 0.0 }
 0x452   : > { %v564_v37 = vsub.f32 %v560_v35, %v552_v3 }
 0x45a   : > { %v1611_v33 = vpop.eup %1610 }
 0x45b   : > { %v565_v36 = vmul.f32 %v1611_v33, %v563_v32 }
 0x45e   : > { %v1613_v38 = vpop.eup %1612 }
 0x45f   : > { %v566_v39 = vmul.f32 %v1613_v38, %v564_v37 }
 0x46a   : > { %567 = vxpose.xlu0.b32.start [1/2] (short) (narrow) %v1611_v33, 8 }
 0x46e   : > { %568 = vxpose.xlu0.b32.end [2/2] (short) (narrow) %v1613_v38, 8 }
 0x470   : > { %v1132_v40 = vpop.trf.xlu0 }
 0x471   : > { %v1148_v41 = vadd.f32 %v1132_v40, %v1114_v8 }
 0x473   : > { %v2090_v42 = vmul.f32 0.5, %v1148_v41 }
 0x474   : > { %v1133_v44 = vpop.trf.xlu0 }
 0x475   : > { %v1152_v43 = vsel %vm494_vm5, %v2090_v42, 0.0  ;;  %v1149_v6 = vadd.f32 %v1133_v44, %v2079_v10 }
 0x476   : > { %1153 = vadd.xlane.f32.xlu1 %v1152_v43 }
 0x477   : > { %v1151_v27 = vmul.f32 0.5, %v1149_v6 }
 0x479   : > { %v1155_v7 = vsel %vm494_vm5, %v1151_v27, 0.0 }
 0x4b3   : > { %v754_v45 = vpop.xlane.xlu0 %753 }
 0x4b4   : > { %1614 = vrsqrt.f32 %v754_v45  ;;  %v758_v47 = vsel %vm2041_vm6, %v754_v45, 0.0 }
 0x4b5   : > { %v762_v48 = vsub.f32 %v758_v47, %v750_v13 }
 0x4b7   : > { %v757_v46 = vpop.xlane.xlu0 %756 }
 0x4b8   : > { %1616 = vrsqrt.f32 %v757_v46  ;;  %v759_v50 = vsel %vm2036_vm4, %v757_v46, 0.0 }
 0x4b9   : > { %v763_v53 = vsub.f32 %v759_v50, %v751_v17 }
 0x4c1   : > { %v1615_v49 = vpop.eup %1614 }
 0x4c2   : > { %v954_v51 = vpop.xlane.xlu1 %953  ;;  %766 = vxpose.xlu0.b32.start [1/2] (short) (narrow) %v1615_v49, 8  ;;  %v764_v52 = vmul.f32 %v1615_v49, %v762_v48 }
 0x4c3   : > { %1618 = vrsqrt.f32 %v954_v51  ;;  %v958_v57 = vsel %vm2041_vm6, %v954_v51, 0.0 }
 0x4c4   : > { %v962_v58 = vsub.f32 %v958_v57, %v950_v21 }
 0x4c5   : > { %v1617_v54 = vpop.eup %1616 }
 0x4c6   : > { %v957_v55 = vpop.xlane.xlu0 %956  ;;  %767 = vxpose.xlu0.b32.end [2/2] (short) (narrow) %v1617_v54, 8  ;;  %v765_v56 = vmul.f32 %v1617_v54, %v763_v53 }
 0x4c7   : > { %1620 = vrsqrt.f32 %v957_v55  ;;  %v959_v60 = vsel %vm2036_vm4, %v957_v55, 0.0 }
 0x4c8   : > { %v963_v62 = vsub.f32 %v959_v60, %v951_v25 }
 0x4d0   : > { %v1619_v59 = vpop.eup %1618 }
 0x4d1   : > { %966 = vxpose.xlu1.b32.start [1/2] (short) (narrow) %v1619_v59, 8  ;;  %v964_v61 = vmul.f32 %v1619_v59, %v962_v58 }
 0x4d4   : > { %v1621_v63 = vpop.eup %1620 }
 0x4d5   : > { %967 = vxpose.xlu1.b32.end [2/2] (short) (narrow) %v1621_v63, 8  ;;  %v965_v0 = vmul.f32 %v1621_v63, %v963_v62 }
 0x4e6   : > { %v583_v2 = vpop.trf.xlu0 }
 0x4e7   : > { %v602_v3 = vrot.slane %v583_v2, %v2103_v1 }
 0x4e9   : > { %v603_v4 = vmul.f32 %v602_v3, %v565_v36  ;;  %v604_v5 = vmul.f32 %v602_v3, %v566_v39 }
 0x4eb   : > { %605 = vst.msk [vmem:[%s2108_s7] sm:$0xff] %vm494_vm5, %v603_v4  ;;  %606 = vst.msk [vmem:[%s2108_s7 + $0x8] sm:$0xff] %vm494_vm5, %v604_v5 }
 0x4f3   : > { %1156 = vadd.xlane.f32.xlu0 %v1155_v7 }
 0x4ff   : > { %v1154_v8 = vpop.xlane.xlu1 %1153 }
 0x500   : > { %1622 = vrsqrt.f32 %v1154_v8 }
 0x50d   : > { %v1623_v9 = vpop.eup %1622 }
 0x50e   : > { %1166 = vxpose.xlu1.b32.start [1/2] (short) (narrow) %v1623_v9, 8 }
 0x53e   : > { %v782_v10 = vpop.trf.xlu0 }
 0x53f   : > { %v801_v11 = vrot.slane %v782_v10, %v2103_v1 }
 0x541   : > { %v802_v12 = vmul.f32 %v801_v11, %v764_v52  ;;  %v803_v13 = vmul.f32 %v801_v11, %v765_v56 }
 0x543   : > { %1397 = vst.msk [vmem:[%s2108_s7 + $0x10] sm:$0xff] %vm494_vm5, %v802_v12  ;;  %1398 = vst.msk [vmem:[%s2108_s7 + $0x18] sm:$0xff] %vm494_vm5, %v803_v13 }
 0x54d   : > { %v982_v14 = vpop.trf.xlu1 }
 0x54e   : > { %v1001_v15 = vrot.slane %v982_v14, %v2103_v1 }
 0x550   : > { %v1002_v16 = vmul.f32 %v1001_v15, %v964_v61  ;;  %v1003_v17 = vmul.f32 %v1001_v15, %v965_v0 }
 0x552   : > { %1403 = vst.msk [vmem:[%s2108_s7 + $0x20] sm:$0xff] %vm494_vm5, %v1002_v16  ;;  %1404 = vst.msk [vmem:[%s2108_s7 + $0x28] sm:$0xff] %vm494_vm5, %v1003_v17 }
 0x57c   : > { %v1157_v18 = vpop.xlane.xlu0 %1156 }
 0x57d   : > { %1624 = vrsqrt.f32 %v1157_v18  ;;  %v1159_v19 = vsel %vm2036_vm4, %v1157_v18, 0.0 }
 0x57e   : > { %v1163_v20 = vsub.f32 %v1159_v19, %v1151_v27 }
 0x58a   : > { %v1625_v21 = vpop.eup %1624 }
 0x58b   : > { %v1165_v22 = vmul.f32 %v1625_v21, %v1163_v20  ;;  %1167 = vxpose.xlu1.b32.end [2/2] (short) (narrow) %v1625_v21, 8 }
 0x58c   : > { %1719 = shalt.err (!%p1716_p3)
}
 0x58d   : > { %s1720_s21 = scalar_lea.hbm %s2134_s28, 128  ;;  %s1724_s5 = scalar_lea.hbm %s2221_s4, 256 }
 0x58e   : > { %p1721_p11 = scmp.ne.s32.totalorder %s2134_s28, %s1720_s21  ;;  %p1725_p4 = scmp.lt.s32.totalorder %s2134_s28, %s2221_s4 }
 0x58f   : > { %p1726_p6 = scmp.lt.s32.totalorder %s1724_s5, %s1720_s21 }
 0x590   : > { %p1722_p9 = pnand %p1721_p11, %p2240_p2 }
 0x591   : > { %p1727_p8 = por %p1726_p6, %p1725_p4 }
 0x592   : > { %p1723_p1 = pneg %p1722_p9 }
 0x594   : > { %p1728_p5 = pnand %p1727_p8, %p1723_p1 }
 0x596   : > { %1731 = shalt.err (!%p1728_p5)
}
 0x597   : > { %s1817_s27 = smov 64   ;;  %s1818_s24 = smov 4   ;;  %v1158_v31 = vsel %vm2041_vm6, %v1154_v8, 0.0 }
 0x598   : > { %1501 = dma.vmem_to_hbm [thread:$0]  (%p2240_p2), %s2128_s9, 128, %s2134_s28, %s1213_s6, %s1817_s27, %s1817_s27, %s1818_s24   ;;  %v1162_v23 = vsub.f32 %v1158_v31, %v2090_v42 }
 0x599   : > { %s1422_s12 = sshll.u32 %s1868_s19, 10  ;;  %s1226_s13 = sshll.u32 %s2108_s7, 4  ;;  %s2170_s13 = int_to_ptr.vmem [resolvable:$true] %s1226_s13 }
 0x59a   : > { %v1164_v25 = vmul.f32 %v1623_v9, %v1162_v23  ;;  %s2168_s21 = scalar_lea.hbm %s2220_s3, %s1422_s12  ;;  %s1208_s19 = scalar_lea.sflag [#allocation4], %s1983_s10 }
 0x59b   : > { %s1732_s9 = scalar_lea.vmem %s2170_s13, 1024  ;;  %s1819_s28 = smov [#allocation8]  }
 0x59c   : > { %p1733_p7 = scmp.ne.s32.totalorder %s2170_s13, %s1732_s9  ;;  %s1736_s6 = sshll.u32 %s1819_s28, 4  ;;  %s1737_s6 = int_to_ptr.vmem [resolvable:$false] %s1736_s6 }
 0x59d   : > { %s1738_s23 = scalar_lea.vmem %s1737_s6, 2048  ;;  %p1739_p0 = scmp.lt.s32.totalorder %s2170_s13, %s1737_s6 }
 0x59e   : > { %p1734_p12 = pnand %p1733_p7, %p2240_p2  ;;  %p1740_p10 = scmp.lt.s32.totalorder %s1738_s23, %s1732_s9 }
 0x5a0   : > { %p1735_p13 = pneg %p1734_p12  ;;  %p1741_p3 = por %p1740_p10, %p1739_p0 }
 0x5a2   : > { %p1742_p11 = pnand %p1741_p3, %p1735_p13 }
 0x603   : > { %v1182_v24 = vpop.trf.xlu1 }
 0x604   : > { %v1201_v26 = vrot.slane %v1182_v24, %v2103_v1 }
 0x606   : > { %v1202_v34 = vmul.f32 %v1201_v26, %v1164_v25  ;;  %v1203_v28 = vmul.f32 %v1201_v26, %v1165_v22 }
 0x608   : > { %1409 = vst.msk [vmem:[%s2108_s7 + $0x30] sm:$0xff] %vm494_vm5, %v1202_v34  ;;  %1410 = vst.msk [vmem:[%s2108_s7 + $0x38] sm:$0xff] %vm494_vm5, %v1203_v28 }
 0x609   : > { %1745 = shalt.err (!%p1742_p11)
}
 0x60a   : > { %s1746_s7 = scalar_lea.hbm %s2168_s21, 1024  ;;  %s1750_s29 = scalar_lea.hbm %s2220_s3, 2048 }
 0x60b   : > { %p1747_p9 = scmp.ne.s32.totalorder %s2168_s21, %s1746_s7  ;;  %p1751_p6 = scmp.lt.s32.totalorder %s2168_s21, %s2220_s3 }
 0x60c   : > { %p1752_p8 = scmp.lt.s32.totalorder %s1750_s29, %s1746_s7 }
 0x60d   : > { %p1748_p1 = pnand %p1747_p9, %p2240_p2 }
 0x60e   : > { %p1753_p5 = por %p1752_p8, %p1751_p6 }
 0x60f   : > { %p1749_p4 = pneg %p1748_p1 }
 0x611   : > { %p1754_p7 = pnand %p1753_p5, %p1749_p4 }
 0x613   : > { %1757 = shalt.err (!%p1754_p7)
}
 0x614   : > { %s1820_s24 = smov 128   ;;  %s1821_s12 = smov 8  }
 0x615   : > { %1500 = dma.vmem_to_hbm [thread:$0]  (%p2240_p2), %s2170_s13, 1024, %s2168_s21, %s1208_s19, %s1820_s24, %s1820_s24, %s1821_s12  }
 0x616 PF: > { %s1257_s25 = sand.u32 1, %s1792_s15   ;;  %p2241_p12 = scmp.ne.s32.totalorder %s2227_s22, 0 }
 0x617   : > { %p2242_p13 = scmp.ge.s32.totalorder %s1804_s18, 2  ;;  %s1258_s8 = scalar_lea.sflag [#allocation4], %s1257_s25 }
 0x619   : > { %p1516_p0 = pnand %p2242_p13, %p2241_p12 }
 0x61b   : > { %p1517_p10 = pneg %p1516_p0 }
 0x61d   : > { %1783 = dma.done.wait (%p1517_p10), %s1258_s8, 1024  }
 0x61e   : > { %1785 = vsyncadd (%p1517_p10), %s1258_s8, 4294966272  ;;  %s1267_s9 = scalar_lea.sflag [#allocation10], %s1257_s25 }
 0x61f   : > { %1787 = dma.done.wait (%p1517_p10), %s1267_s9, 128  }
 0x620   : > { %1789 = vsyncadd (%p1517_p10), %s1267_s9, 4294967168  ;;  %p22_p2 = scmp.ge.s32.totalorder %s1925_s11, 4   ;;  %s2243_s15 = smov %s1796_s16 }
 0x621   : > { %s2244_s16 = smov %s1800_s17  ;;  %s2245_s17 = smov %s1941_s20 }
 0x622   : > { %s2246_s18 = smov %s1925_s11  ;;  %24 = sbr.rel (!%p22_p2) target bundleno = 8 (0x8), region = 105 }
 0x627   :  { %1272 = vsyncpa [#allocation3], 1 }
 0x628   :  { %1274 = vsyncpa [#allocation3 + $0x1], 1 }
 0x629   :  { %1275 = vsyncpa [#allocation6], 1 }
 0x62a   :  { %1276 = vsyncpa [#allocation4], 1 }
 0x62b   :  { %1278 = vsyncpa [#allocation4 + $0x1], 1 }
 0x62c   :  { %1279 = vsyncpa [#allocation10], 1 }
 0x62d   :  { %1281 = vsyncpa [#allocation10 + $0x1], 1 }

</bundles_post_ra>
